<compile_context>
chip_gen: v5e
topology: v5e:2x2
jax: 0.10.0
libtpu: 0.0.40
codegen_flags: <defaults>
</compile_context>

<pallas_src>
import jax
import jax.numpy as jnp
from jax.experimental import pallas as pl
from jax.experimental.pallas import tpu as pltpu

EPS = 1e-5
CONV_DTYPE = jnp.bfloat16        # set to jnp.float32 for bit-tight accuracy


def _banded_weights(w, width):
    """w: (3, 3, Cin, Cout) -> (3*width*Cin, width*Cout) stacked banded matrix.

    band[kh, win*Cin + ci, wout*Cout + co] = w[kh, win - wout + 1, ci, co]
    when |win - wout| <= 1, else 0.  Horizontal taps and the zero padding
    along W are folded into the band; the 3 vertical taps are stacked along K
    so a full 3x3 conv is a single matmul against
    concat([shift_up(z), z, shift_down(z)], lanes).
    """
    _, _, cin, cout = w.shape
    win = jnp.arange(width)[:, None]
    wout = jnp.arange(width)[None, :]
    kw = win - wout + 1                                    # (W, W)
    valid = (kw >= 0) & (kw <= 2)
    blocks = w[:, jnp.clip(kw, 0, 2)]                      # (3, W, W, Cin, Cout)
    blocks = jnp.where(valid[None, :, :, None, None], blocks, 0.0)
    return jnp.transpose(blocks, (0, 1, 3, 2, 4)).reshape(
        3 * width * cin, width * cout)


def prepare_params(w1, g1, b1, w2, g2, b2, n, h, w):
    """Precompute kernel operands once (hoisted out of the per-call path)."""
    cout = w1.shape[-1]
    band = jnp.stack([_banded_weights(w1.astype(jnp.float32), w),
                      _banded_weights(w2.astype(jnp.float32), w)])
    band = band.astype(CONV_DTYPE)                         # (2, 3*W*C, W*C)

    # Channel-averaging projector: proj[w*C+c, w'*C+c'] = [c==c'] / (N*H*W).
    c_idx = jnp.arange(w * cout) % cout
    proj = (c_idx[:, None] == c_idx[None, :]).astype(jnp.float32)
    proj = proj / float(n * h * w)

    def tile_c(v):                                         # (C,) -> (W*C,)
        return jnp.tile(v.astype(jnp.float32), (w,))

    gb = jnp.stack([tile_c(g1), tile_c(b1), tile_c(g2), tile_c(b2)])
    return band, proj, gb


def _make_kernel(height, eps, conv_dtype):
    def kernel(x_ref, band_ref, proj_ref, gb_ref, o_ref):
        x = x_ref[...]                                     # (N*H, W*C) f32
        nh, _ = x.shape
        proj = proj_ref[...]                               # (W*C, W*C) f32
        gb = gb_ref[...]                                   # (4, W*C)   f32

        # (N*H, 1) image-border masks for the vertical taps; jnp.where
        # lane-broadcasts them, so no full-width iota/mask vregs stay live.
        row = jax.lax.broadcasted_iota(jnp.int32, (nh, 1), 0) % height
        has_above = row >= 1                     # input row h-1 exists
        has_below = row <= height - 2            # input row h+1 exists

        def conv3x3(z, band):                    # band: (3*W*C, W*C) bf16
            up = jnp.where(has_above, pltpu.roll(z, shift=1, axis=0), 0.0)
            dn = jnp.where(has_below, pltpu.roll(z, shift=nh - 1, axis=0), 0.0)
            taps = jnp.concatenate([up, z, dn], axis=1)    # (N*H, 3*W*C)
            return jnp.dot(taps.astype(conv_dtype), band,
                           preferred_element_type=jnp.float32)

        def batchnorm(z, g, b):
            # Channel stats over (N, H, W): sublane-reduce sum and sum-of-
            # squares, then ONE (2, W*C) @ (W*C, W*C) MXU matmul collapses the
            # W positions of each channel (no mean->var serial dependency).
            sums = jnp.concatenate(
                [jnp.sum(z, axis=0, keepdims=True),
                 jnp.sum(z * z, axis=0, keepdims=True)], axis=0)
            stats = jnp.dot(sums, proj, preferred_element_type=jnp.float32)
            mean = stats[0:1]                              # (1, W*C)
            var = stats[1:2] - mean * mean
            scale = jax.lax.rsqrt(var + eps) * g           # gamma folded in
            return z * scale + (b - mean * scale)          # one slab-wide FMA

        z = conv3x3(x, band_ref[0])
        z = jnp.maximum(batchnorm(z, gb[0:1], gb[1:2]), 0.0)
        z = conv3x3(z, band_ref[1])
        z = batchnorm(z, gb[2:3], gb[3:4])
        o_ref[...] = jnp.maximum(z + x, 0.0)               # identity shortcut

    return kernel


@jax.jit
def residual_block_nhwc(x_nhwc, band, proj, gb):
    """x_nhwc: (N, H, W, C) float32; band/proj/gb from prepare_params."""
    n, h, w, c = x_nhwc.shape
    # Lane-dense slab: rows = N*H (sublanes), cols = W*C (lanes). Free reshape.
    x2d = x_nhwc.astype(jnp.float32).reshape(n * h, w * c)

    vmem = pl.BlockSpec(memory_space=pltpu.MemorySpace.VMEM)
    out2d = pl.pallas_call(
        _make_kernel(h, EPS, CONV_DTYPE),
        out_shape=jax.ShapeDtypeStruct((n * h, w * c), jnp.float32),
        in_specs=[vmem] * 4,
        out_specs=vmem,
    )(x2d, band, proj, gb)
    return out2d.reshape(n, h, w, c)


def _reference_nhwc(x, w1, g1, b1, w2, g2, b2):
    """Pure-JAX reference of the PyTorch forward (training-mode BN), NHWC."""
    def conv(z, wk):                            # wk: (3, 3, Cin, Cout) = HWIO
        return jax.lax.conv_general_dilated(
            z, wk, window_strides=(1, 1), padding=((1, 1), (1, 1)),
            dimension_numbers=("NHWC", "HWIO", "NHWC"),
            precision=jax.lax.Precision.HIGHEST)

    def bn(z, g, b):
        mean = jnp.mean(z, axis=(0, 1, 2), keepdims=True)
        var = jnp.mean((z - mean) ** 2, axis=(0, 1, 2), keepdims=True)
        return (z - mean) * jax.lax.rsqrt(var + EPS) * g + b

    z = jnp.maximum(bn(conv(x, w1), g1, b1), 0.0)
    z = bn(conv(z, w2), g2, b2)
    return jnp.maximum(z + x, 0.0)


if __name__ == "__main__":
    # N=2, inchannel=outchannel=8, 16x16 spatial -> lane-dense (32, 128) slab.
    N, C, H, W = 2, 8, 16, 16

    key = jax.random.PRNGKey(0)
    kx, k1, k2, k3, k4, k5, k6 = jax.random.split(key, 7)
    x = jax.random.normal(kx, (N, H, W, C), jnp.float32)   # NHWC activations

    # Conv weights in (3, 3, Cin, Cout) layout (HWIO).
    fan_in = C * 3 * 3
    bound = 1.0 / (fan_in ** 0.5)
    w1 = jax.random.uniform(k1, (3, 3, C, C), jnp.float32, -bound, bound)
    w2 = jax.random.uniform(k2, (3, 3, C, C), jnp.float32, -bound, bound)

    # BatchNorm affine params (perturbed from the default 1/0 init so the
    # folded-gamma path is actually exercised).
    g1 = 1.0 + 0.1 * jax.random.normal(k3, (C,), jnp.float32)
    b1 = 0.1 * jax.random.normal(k4, (C,), jnp.float32)
    g2 = 1.0 + 0.1 * jax.random.normal(k5, (C,), jnp.float32)
    b2 = 0.1 * jax.random.normal(k6, (C,), jnp.float32)

    # Hoisted, reusable kernel operands (bands, projector, packed gamma/beta).
    band, proj, gb = prepare_params(w1, g1, b1, w2, g2, b2, N, H, W)

    out = residual_block_nhwc(x, band, proj, gb)
    out = jax.block_until_ready(out)
    assert out.shape == (N, H, W, C)
    assert bool(jnp.all(out >= 0.0))

    ref = jax.block_until_ready(_reference_nhwc(x, w1, g1, b1, w2, g2, b2))
    max_err = float(jnp.max(jnp.abs(out - ref)))
    # bf16 conv operands (f32 accumulate) trade a little accuracy for ~3x MXU
    # throughput; tolerance loosened accordingly (f32 mode keeps 2e-3).
    tol = 2e-3 if CONV_DTYPE is jnp.float32 else 4e-2
    assert max_err < tol, f"mismatch vs reference: max |err| = {max_err}"
    print("KERNEL_OK")
</pallas_src>

<mosaic_0001>
module attributes {stable_mosaic.version = 11 : i64} {
  func.func @kernel(%arg0: memref<32x128xf32, #tpu.memory_space<vmem>>, %arg1: memref<2x384x128xbf16, #tpu.memory_space<vmem>>, %arg2: memref<128x128xf32, #tpu.memory_space<vmem>>, %arg3: memref<4x128xf32, #tpu.memory_space<vmem>>, %arg4: memref<32x128xf32, #tpu.memory_space<vmem>>) attributes {dimension_semantics = [], scalar_prefetch = 0 : i64, scratch_operands = 0 : i64, tpu.core_type = #tpu.core_type<tc>} {
    %c0 = arith.constant 0 : index
    %c0_0 = arith.constant 0 : index
    %0 = vector.load %arg0[%c0, %c0_0] : memref<32x128xf32, #tpu.memory_space<vmem>>, vector<32x128xf32>
    %c0_1 = arith.constant 0 : index
    %c0_2 = arith.constant 0 : index
    %1 = vector.load %arg2[%c0_1, %c0_2] : memref<128x128xf32, #tpu.memory_space<vmem>>, vector<128x128xf32>
    %c0_3 = arith.constant 0 : index
    %c0_4 = arith.constant 0 : index
    %2 = vector.load %arg3[%c0_3, %c0_4] : memref<4x128xf32, #tpu.memory_space<vmem>>, vector<4x128xf32>
    %3 = tpu.iota {dimensions = array<i32: 0>} : vector<32x1xi32>
    %c16_i32 = arith.constant 16 : i32
    %c0_i32 = arith.constant 0 : i32
    %4 = arith.cmpi eq, %c16_i32, %c0_i32 : i32
    %c1_i32 = arith.constant 1 : i32
    %5 = arith.select %4, %c1_i32, %c16_i32 : i32
    %6 = vector.broadcast %5 : i32 to vector<32x1xi32>
    %7 = arith.remsi %3, %6 : vector<32x1xi32>
    %c0_i32_5 = arith.constant 0 : i32
    %8 = vector.broadcast %c0_i32_5 : i32 to vector<32x1xi32>
    %9 = arith.cmpi ne, %7, %8 : vector<32x1xi32>
    %c0_i32_6 = arith.constant 0 : i32
    %10 = vector.broadcast %c0_i32_6 : i32 to vector<32x1xi32>
    %11 = arith.cmpi slt, %7, %10 : vector<32x1xi32>
    %c0_i32_7 = arith.constant 0 : i32
    %12 = arith.cmpi slt, %5, %c0_i32_7 : i32
    %13 = vector.broadcast %12 : i1 to vector<32x1xi1>
    %14 = vector.broadcast %13 : vector<32x1xi1> to vector<32x1xi1>
    %15 = arith.xori %11, %14 : vector<32x1xi1>
    %16 = arith.andi %15, %9 : vector<32x1xi1>
    %17 = vector.broadcast %5 : i32 to vector<32x1xi32>
    %18 = arith.addi %7, %17 : vector<32x1xi32>
    %19 = arith.select %16, %18, %7 : vector<32x1xi1>, vector<32x1xi32>
    %c1_i32_8 = arith.constant 1 : i32
    %20 = vector.broadcast %c1_i32_8 : i32 to vector<32x1xi32>
    %21 = arith.cmpi sge, %19, %20 : vector<32x1xi32>
    %c14_i32 = arith.constant 14 : i32
    %22 = vector.broadcast %c14_i32 : i32 to vector<32x1xi32>
    %23 = arith.cmpi sle, %19, %22 : vector<32x1xi32>
    %c0_9 = arith.constant 0 : index
    %c0_10 = arith.constant 0 : index
    %c0_11 = arith.constant 0 : index
    %24 = vector.load %arg1[%c0_9, %c0_10, %c0_11] : memref<2x384x128xbf16, #tpu.memory_space<vmem>>, vector<1x384x128xbf16>
    %25 = vector.shape_cast %24 : vector<1x384x128xbf16> to vector<384x128xbf16>
    %c1_i32_12 = arith.constant 1 : i32
    %26 = tpu.dynamic_rotate %0 by %c1_i32_12 dim 0 : vector<32x128xf32>, i32 -> vector<32x128xf32>
    %cst = arith.constant 0.000000e+00 : f32
    %27 = vector.shape_cast %21 : vector<32x1xi1> to vector<32x1xi1>
    %28 = vector.broadcast %27 : vector<32x1xi1> to vector<32x128xi1>
    %29 = vector.broadcast %cst : f32 to vector<32x128xf32>
    %30 = arith.select %28, %26, %29 : vector<32x128xi1>, vector<32x128xf32>
    %c31_i32 = arith.constant 31 : i32
    %31 = tpu.dynamic_rotate %0 by %c31_i32 dim 0 : vector<32x128xf32>, i32 -> vector<32x128xf32>
    %cst_13 = arith.constant 0.000000e+00 : f32
    %32 = vector.shape_cast %23 : vector<32x1xi1> to vector<32x1xi1>
    %33 = vector.broadcast %32 : vector<32x1xi1> to vector<32x128xi1>
    %34 = vector.broadcast %cst_13 : f32 to vector<32x128xf32>
    %35 = arith.select %33, %31, %34 : vector<32x128xi1>, vector<32x128xf32>
    %36 = tpu.concatenate %30, %0, %35 in 1 : vector<32x128xf32>, vector<32x128xf32>, vector<32x128xf32> -> vector<32x384xf32>
    %37 = arith.truncf %36 : vector<32x384xf32> to vector<32x384xbf16>
    %cst_14 = arith.constant dense<0.000000e+00> : vector<32x128xf32>
    %38 = tpu.matmul %37, %25, %cst_14 {dimension_numbers = #tpu.dot_dimension_numbers<[1], [0], [0], [1], [0, 0, 1, 1], [], []>} : vector<32x384xbf16>, vector<384x128xbf16>, vector<32x128xf32> -> vector<32x128xf32>
    %39 = vector.extract_strided_slice %2 {offsets = [0, 0], sizes = [1, 128], strides = [1, 1]} : vector<4x128xf32> to vector<1x128xf32>
    %40 = vector.extract_strided_slice %2 {offsets = [1, 0], sizes = [1, 128], strides = [1, 1]} : vector<4x128xf32> to vector<1x128xf32>
    %cst_15 = arith.constant dense<0.000000e+00> : vector<128xf32>
    %41 = vector.multi_reduction <add>, %38, %cst_15 [0] : vector<32x128xf32> to vector<128xf32>
    %42 = vector.shape_cast %41 : vector<128xf32> to vector<1x128xf32>
    %43 = arith.mulf %38, %38 : vector<32x128xf32>
    %cst_16 = arith.constant dense<0.000000e+00> : vector<128xf32>
    %44 = vector.multi_reduction <add>, %43, %cst_16 [0] : vector<32x128xf32> to vector<128xf32>
    %45 = vector.shape_cast %44 : vector<128xf32> to vector<1x128xf32>
    %46 = tpu.concatenate %42, %45 in 0 : vector<1x128xf32>, vector<1x128xf32> -> vector<2x128xf32>
    %cst_17 = arith.constant dense<0.000000e+00> : vector<2x128xf32>
    %47 = tpu.matmul %46, %1, %cst_17 {dimension_numbers = #tpu.dot_dimension_numbers<[1], [0], [0], [1], [0, 0, 1, 1], [], []>} : vector<2x128xf32>, vector<128x128xf32>, vector<2x128xf32> -> vector<2x128xf32>
    %48 = vector.extract_strided_slice %47 {offsets = [0, 0], sizes = [1, 128], strides = [1, 1]} : vector<2x128xf32> to vector<1x128xf32>
    %49 = vector.extract_strided_slice %47 {offsets = [1, 0], sizes = [1, 128], strides = [1, 1]} : vector<2x128xf32> to vector<1x128xf32>
    %50 = arith.mulf %48, %48 : vector<1x128xf32>
    %51 = arith.subf %49, %50 : vector<1x128xf32>
    %cst_18 = arith.constant 9.99999974E-6 : f32
    %52 = vector.broadcast %cst_18 : f32 to vector<1x128xf32>
    %53 = arith.addf %51, %52 : vector<1x128xf32>
    %54 = math.rsqrt %53 : vector<1x128xf32>
    %55 = arith.mulf %54, %39 : vector<1x128xf32>
    %56 = vector.broadcast %55 : vector<1x128xf32> to vector<32x128xf32>
    %57 = arith.mulf %38, %56 : vector<32x128xf32>
    %58 = arith.mulf %48, %55 : vector<1x128xf32>
    %59 = arith.subf %40, %58 : vector<1x128xf32>
    %60 = vector.broadcast %59 : vector<1x128xf32> to vector<32x128xf32>
    %61 = arith.addf %57, %60 : vector<32x128xf32>
    %cst_19 = arith.constant 0.000000e+00 : f32
    %62 = vector.broadcast %cst_19 : f32 to vector<32x128xf32>
    %63 = arith.maximumf %61, %62 : vector<32x128xf32>
    %c1 = arith.constant 1 : index
    %c0_20 = arith.constant 0 : index
    %c0_21 = arith.constant 0 : index
    %64 = vector.load %arg1[%c1, %c0_20, %c0_21] : memref<2x384x128xbf16, #tpu.memory_space<vmem>>, vector<1x384x128xbf16>
    %65 = vector.shape_cast %64 : vector<1x384x128xbf16> to vector<384x128xbf16>
    %c1_i32_22 = arith.constant 1 : i32
    %66 = tpu.dynamic_rotate %63 by %c1_i32_22 dim 0 : vector<32x128xf32>, i32 -> vector<32x128xf32>
    %cst_23 = arith.constant 0.000000e+00 : f32
    %67 = vector.shape_cast %21 : vector<32x1xi1> to vector<32x1xi1>
    %68 = vector.broadcast %67 : vector<32x1xi1> to vector<32x128xi1>
    %69 = vector.broadcast %cst_23 : f32 to vector<32x128xf32>
    %70 = arith.select %68, %66, %69 : vector<32x128xi1>, vector<32x128xf32>
    %c31_i32_24 = arith.constant 31 : i32
    %71 = tpu.dynamic_rotate %63 by %c31_i32_24 dim 0 : vector<32x128xf32>, i32 -> vector<32x128xf32>
    %cst_25 = arith.constant 0.000000e+00 : f32
    %72 = vector.shape_cast %23 : vector<32x1xi1> to vector<32x1xi1>
    %73 = vector.broadcast %72 : vector<32x1xi1> to vector<32x128xi1>
    %74 = vector.broadcast %cst_25 : f32 to vector<32x128xf32>
    %75 = arith.select %73, %71, %74 : vector<32x128xi1>, vector<32x128xf32>
    %76 = tpu.concatenate %70, %63, %75 in 1 : vector<32x128xf32>, vector<32x128xf32>, vector<32x128xf32> -> vector<32x384xf32>
    %77 = arith.truncf %76 : vector<32x384xf32> to vector<32x384xbf16>
    %cst_26 = arith.constant dense<0.000000e+00> : vector<32x128xf32>
    %78 = tpu.matmul %77, %65, %cst_26 {dimension_numbers = #tpu.dot_dimension_numbers<[1], [0], [0], [1], [0, 0, 1, 1], [], []>} : vector<32x384xbf16>, vector<384x128xbf16>, vector<32x128xf32> -> vector<32x128xf32>
    %79 = vector.extract_strided_slice %2 {offsets = [2, 0], sizes = [1, 128], strides = [1, 1]} : vector<4x128xf32> to vector<1x128xf32>
    %80 = vector.extract_strided_slice %2 {offsets = [3, 0], sizes = [1, 128], strides = [1, 1]} : vector<4x128xf32> to vector<1x128xf32>
    %cst_27 = arith.constant dense<0.000000e+00> : vector<128xf32>
    %81 = vector.multi_reduction <add>, %78, %cst_27 [0] : vector<32x128xf32> to vector<128xf32>
    %82 = vector.shape_cast %81 : vector<128xf32> to vector<1x128xf32>
    %83 = arith.mulf %78, %78 : vector<32x128xf32>
    %cst_28 = arith.constant dense<0.000000e+00> : vector<128xf32>
    %84 = vector.multi_reduction <add>, %83, %cst_28 [0] : vector<32x128xf32> to vector<128xf32>
    %85 = vector.shape_cast %84 : vector<128xf32> to vector<1x128xf32>
    %86 = tpu.concatenate %82, %85 in 0 : vector<1x128xf32>, vector<1x128xf32> -> vector<2x128xf32>
    %cst_29 = arith.constant dense<0.000000e+00> : vector<2x128xf32>
    %87 = tpu.matmul %86, %1, %cst_29 {dimension_numbers = #tpu.dot_dimension_numbers<[1], [0], [0], [1], [0, 0, 1, 1], [], []>} : vector<2x128xf32>, vector<128x128xf32>, vector<2x128xf32> -> vector<2x128xf32>
    %88 = vector.extract_strided_slice %87 {offsets = [0, 0], sizes = [1, 128], strides = [1, 1]} : vector<2x128xf32> to vector<1x128xf32>
    %89 = vector.extract_strided_slice %87 {offsets = [1, 0], sizes = [1, 128], strides = [1, 1]} : vector<2x128xf32> to vector<1x128xf32>
    %90 = arith.mulf %88, %88 : vector<1x128xf32>
    %91 = arith.subf %89, %90 : vector<1x128xf32>
    %cst_30 = arith.constant 9.99999974E-6 : f32
    %92 = vector.broadcast %cst_30 : f32 to vector<1x128xf32>
    %93 = arith.addf %91, %92 : vector<1x128xf32>
    %94 = math.rsqrt %93 : vector<1x128xf32>
    %95 = arith.mulf %94, %79 : vector<1x128xf32>
    %96 = vector.broadcast %95 : vector<1x128xf32> to vector<32x128xf32>
    %97 = arith.mulf %78, %96 : vector<32x128xf32>
    %98 = arith.mulf %88, %95 : vector<1x128xf32>
    %99 = arith.subf %80, %98 : vector<1x128xf32>
    %100 = vector.broadcast %99 : vector<1x128xf32> to vector<32x128xf32>
    %101 = arith.addf %97, %100 : vector<32x128xf32>
    %102 = arith.addf %101, %0 : vector<32x128xf32>
    %cst_31 = arith.constant 0.000000e+00 : f32
    %103 = vector.broadcast %cst_31 : f32 to vector<32x128xf32>
    %104 = arith.maximumf %102, %103 : vector<32x128xf32>
    %c0_32 = arith.constant 0 : index
    %c0_33 = arith.constant 0 : index
    %105 = vector.load %arg4[%c0_32, %c0_33] : memref<32x128xf32, #tpu.memory_space<vmem>>, vector<32x128xf32>
    tpu.vector_store %arg4[%c0_32, %c0_33], %104 {strides = array<i32>} : memref<32x128xf32, #tpu.memory_space<vmem>>, vector<32x128xf32>,
    return
  }
}

</mosaic_0001>

<bundles_post_ra>
// kernel: residual_block_nhwc.1
= control target key start
LH: loop header
LB: loop body
LE: loop exit
PB: predicated region body
PF: predicated region fallthrough
CT: control target
= control target key end

     0   :  { %v38_v12 = vlaneseq  ;;  %vm1175_vm4 = vmmov 1   ;;  %vm418_vm11 = vcmask 1040384   ;;  %s1552_s1 = inlined_call_operand.vmem [shape: bf16[2,384,128], index: 1, kind: input, shape index: {}]   ;;  %s1553_s0 = inlined_call_operand.vmem [shape: f32[32,128], index: 0, kind: input, shape index: {}]   ;;  %s1554_s2 = inlined_call_operand.vmem [shape: f32[128,128], index: 2, kind: input, shape index: {}]   ;;  %s1555_s3 = inlined_call_operand.vmem [shape: f32[4,128], index: 3, kind: input, shape index: {}]   ;;  %s1556_s4 = inlined_call_operand.vmem [shape: f32[32,128], index: 4, kind: output, shape index: {}]  }
   0x1   :  { %v1129_v0 = vld [vmem:[%s1552_s1 + $0x38] sm:$0xff]  ;;  %v1128_v3 = vld [vmem:[%s1552_s1 + $0x30] sm:$0xff]  ;;  %v1127_v6 = vld [vmem:[%s1552_s1 + $0x28] sm:$0xff] }
   0x2   :  { %v1137_v1 = vld [vmem:[%s1552_s1 + $0x78] sm:$0xff]  ;;  %339 = vmatpush.bf16.msra.mxu0 %v1129_v0  ;;  %v1136_v4 = vld [vmem:[%s1552_s1 + $0x70] sm:$0xff]  ;;  %v1135_v7 = vld [vmem:[%s1552_s1 + $0x68] sm:$0xff]  ;;  %v1246_v16 = vshrl.u32 %v38_v12, 7 }
   0x3   :  { %v1145_v2 = vld [vmem:[%s1552_s1 + $0xb8] sm:$0xff]  ;;  %358 = vmatpush.bf16.msra.mxu1 %v1137_v1  ;;  %v1144_v5 = vld [vmem:[%s1552_s1 + $0xb0] sm:$0xff]  ;;  %v1143_v8 = vld [vmem:[%s1552_s1 + $0xa8] sm:$0xff] }
   0x4   :  { %377 = vmatpush.bf16.msra.mxu2 %v1145_v2  ;;  %v1126_v9 = vld [vmem:[%s1552_s1 + $0x20] sm:$0xff]  ;;  %v1125_v13 = vld [vmem:[%s1552_s1 + $0x18] sm:$0xff]  ;;  %v1124_v17 = vld [vmem:[%s1552_s1 + $0x10] sm:$0xff]  ;;  %v40_v24 = vadd.s32 8, %v1246_v16  ;;  %v47_v27 = vand.u32 15, %v1246_v16  ;;  %vm151_vm0 = vcmp.lt.s32.totalorder %v1246_v16, 1 }
   0x5   :  { %v1134_v10 = vld [vmem:[%s1552_s1 + $0x60] sm:$0xff]  ;;  %v1133_v14 = vld [vmem:[%s1552_s1 + $0x58] sm:$0xff]  ;;  %v1132_v18 = vld [vmem:[%s1552_s1 + $0x50] sm:$0xff]  ;;  %vm172_vm1 = vcmp.lt.s32.totalorder %v1246_v16, 7  ;;  %v41_v48 = vadd.s32 16, %v1246_v16  ;;  %v42_v49 = vadd.s32 24, %v1246_v16 }
   0x6   :  { %340 = vmatpush.bf16.msra.mxu0 %v1128_v3  ;;  %v1142_v11 = vld [vmem:[%s1552_s1 + $0xa0] sm:$0xff]  ;;  %v1141_v15 = vld [vmem:[%s1552_s1 + $0x98] sm:$0xff]  ;;  %v1140_v19 = vld [vmem:[%s1552_s1 + $0x90] sm:$0xff]  ;;  %v54_v35 = vand.u32 15, %v40_v24  ;;  %vm91_vm2 = vcmp.ge.s32.totalorder %v47_v27, 1 }
   0x7   :  { %359 = vmatpush.bf16.msra.mxu1 %v1136_v4  ;;  %v1260_v20 = vld [vmem:[%s1553_s0] sm:$0xff]  ;;  %v1265_v21 = vld [vmem:[%s1553_s0 + $0x8] sm:$0xff]  ;;  %v1270_v22 = vld [vmem:[%s1553_s0 + $0x18] sm:$0xff]  ;;  %v61_v51 = vand.u32 15, %v41_v48  ;;  %v68_v53 = vand.u32 15, %v42_v49 }
   0x8   :  { %378 = vmatpush.bf16.msra.mxu2 %v1144_v5  ;;  %v1275_v23 = vld [vmem:[%s1553_s0 + $0x10] sm:$0xff]  ;;  %v1123_v25 = vld [vmem:[%s1552_s1 + $0x8] sm:$0xff]  ;;  %v147_v28 = vrot.slane %v1260_v20, 7  ;;  %v148_v29 = vrot.slane %v1265_v21, 7  ;;  %v150_v30 = vrot.slane %v1270_v22, 7  ;;  %v168_v32 = vrot.slane %v1260_v20, 1  ;;  %vm1316_vm5 = vmpackc.low %vm1175_vm4, %vm91_vm2 }
   0x9   :  { %v1131_v26 = vld [vmem:[%s1552_s1 + $0x48] sm:$0xff]  ;;  %v169_v33 = vrot.slane %v1265_v21, 1  ;;  %v170_v34 = vrot.slane %v1275_v23, 1  ;;  %v1122_v36 = vld [vmem:[%s1552_s1] sm:$0xff]  ;;  %vm96_vm3 = vcmp.le.s32.totalorder %v54_v35, 14  ;;  %v190_v44 = vpack.c.bf16 %v1265_v21, %v1260_v20  ;;  %v36_v63 = vld [vmem:[%s1554_s2 + $0x78] sm:$0xff] }
   0xa   :  { %341 = vmatpush.bf16.msra.mxu0 %v1127_v6  ;;  %v1139_v31 = vld [vmem:[%s1552_s1 + $0x88] sm:$0xff]  ;;  %v1130_v37 = vld [vmem:[%s1552_s1 + $0x40] sm:$0xff]  ;;  %v154_v38 = vsel %vm151_vm0, %v147_v28, %v148_v29  ;;  %v155_v39 = vsel %vm151_vm0, %v150_v30, %v147_v28  ;;  %vm1321_vm6 = vmpackc.low %vm96_vm3, %vm1175_vm4  ;;  %v149_v50 = vrot.slane %v1275_v23, 7  ;;  %v171_v52 = vrot.slane %v1270_v22, 1  ;;  %420 = vmatpush.msra.mxu3 %v36_v63 }
   0xb   :  { %360 = vmatpush.bf16.msra.mxu1 %v1135_v7  ;;  %v1138_v40 = vld [vmem:[%s1552_s1 + $0x80] sm:$0xff]  ;;  %v174_v41 = vsel %vm172_vm1, %v169_v33, %v170_v34  ;;  %v175_v42 = vsel %vm172_vm1, %v168_v32, %v169_v33  ;;  %v955_v43 = vpack.c.bf16 %v154_v38, %v155_v39  ;;  %vm93_vm7 = vcmp.ge.s32.totalorder %v61_v51, 1  ;;  %v35_v0 = vld [vmem:[%s1554_s2 + $0x70] sm:$0xff]  ;;  %v34_v1 = vld [vmem:[%s1554_s2 + $0x68] sm:$0xff] }
   0xc   :  { %379 = vmatpush.bf16.msra.mxu2 %v1143_v8  ;;  %v961_v46 = vpack.c.bf16 %v174_v41, %v175_v42  ;;  %v152_v54 = vsel %vm151_vm0, %v149_v50, %v150_v30  ;;  %v153_v55 = vsel %vm151_vm0, %v148_v29, %v149_v50  ;;  %v173_v56 = vsel %vm172_vm1, %v170_v34, %v171_v52  ;;  %vm1344_vm9 = vmpackc.low %vm1175_vm4, %vm93_vm7  ;;  %v33_v2 = vld [vmem:[%s1554_s2 + $0x60] sm:$0xff]  ;;  %v32_v3 = vld [vmem:[%s1554_s2 + $0x58] sm:$0xff] }
   0xd   :  { %v176_v57 = vsel %vm172_vm1, %v171_v52, %v168_v32  ;;  %vm98_vm8 = vcmp.le.s32.totalorder %v68_v53, 14  ;;  %v958_v58 = vpack.c.bf16 %v152_v54, %v153_v55  ;;  %v193_v59 = vpack.c.bf16 %v1270_v22, %v1275_v23  ;;  %421 = vmatpush.msra.mxu3 %v35_v0  ;;  %v31_v4 = vld [vmem:[%s1554_s2 + $0x50] sm:$0xff]  ;;  %v30_v5 = vld [vmem:[%s1554_s2 + $0x48] sm:$0xff]  ;;  %v29_v8 = vld [vmem:[%s1554_s2 + $0x40] sm:$0xff] }
   0xe   :  { %342 = vmatpush.bf16.msra.mxu0 %v1126_v9  ;;  %v964_v61 = vpack.c.bf16 %v176_v57, %v173_v56  ;;  %vm1349_vm10 = vmpackc.low %vm98_vm8, %vm1175_vm4  ;;  %v28_v9 = vld [vmem:[%s1554_s2 + $0x38] sm:$0xff] }
   0xf   :  { %361 = vmatpush.bf16.msra.mxu1 %v1134_v10  ;;  %422 = vmatpush.msra.mxu3 %v34_v1  ;;  %v27_v10 = vld [vmem:[%s1554_s2 + $0x30] sm:$0xff] }
  0x10   :  { %380 = vmatpush.bf16.msra.mxu2 %v1142_v11  ;;  %v26_v11 = vld [vmem:[%s1554_s2 + $0x28] sm:$0xff] }
  0x11   :  { %423 = vmatpush.msra.mxu3 %v33_v2 }
  0x12   :  { %343 = vmatpush.bf16.msra.mxu0 %v1125_v13  ;;  %v25_v13 = vld [vmem:[%s1554_s2 + $0x20] sm:$0xff] }
  0x13   :  { %362 = vmatpush.bf16.msra.mxu1 %v1133_v14  ;;  %424 = vmatpush.msra.mxu3 %v32_v3 }
  0x14   :  { %381 = vmatpush.bf16.msra.mxu2 %v1141_v15 }
  0x15   :  { %425 = vmatpush.msra.mxu3 %v31_v4 }
  0x16   :  { %344 = vmatpush.bf16.msra.mxu0 %v1124_v17  ;;  %v24_v17 = vld [vmem:[%s1554_s2 + $0x18] sm:$0xff] }
  0x17   :  { %363 = vmatpush.bf16.msra.mxu1 %v1132_v18  ;;  %426 = vmatpush.msra.mxu3 %v30_v5  ;;  %v23_v18 = vld [vmem:[%s1554_s2 + $0x10] sm:$0xff] }
  0x18   :  { %382 = vmatpush.bf16.msra.mxu2 %v1140_v19  ;;  %v22_v19 = vld [vmem:[%s1554_s2 + $0x8] sm:$0xff] }
  0x19   :  { %427 = vmatpush.msra.mxu3 %v29_v8 }
  0x1a   :  { %345 = vmatpush.bf16.msra.mxu0 %v1123_v25  ;;  %v21_v25 = vld [vmem:[%s1554_s2] sm:$0xff] }
  0x1b   :  { %364 = vmatpush.bf16.msra.mxu1 %v1131_v26  ;;  %428 = vmatpush.msra.mxu3 %v28_v9 }
  0x1c   :  { %383 = vmatpush.bf16.msra.mxu2 %v1139_v31 }
  0x1d   :  { %429 = vmatpush.msra.mxu3 %v27_v10 }
  0x1e   :  { %346 = vmatpush.bf16.msra.mxu0 %v1122_v36 }
  0x1f   :  { %365 = vmatpush.bf16.msra.mxu1 %v1130_v37  ;;  %430 = vmatpush.msra.mxu3 %v26_v11 }
  0x20   :  { %384 = vmatpush.bf16.msra.mxu2 %v1138_v40 }
  0x21   :  { %956 = vmatmul.msk.bf16.vlgmr.msra.gmra.mxu0 %vm1316_vm5, %v955_v43  ;;  %431 = vmatpush.msra.mxu3 %v25_v13 }
  0x22   :  { %366 = vmatmul.bf16.vlgmr.msra.gmra.mxu1 %v190_v44 }
  0x23   :  { %962 = vmatmul.msk.bf16.vlgmr.msra.gmra.mxu2 %vm1321_vm6, %v961_v46  ;;  %432 = vmatpush.msra.mxu3 %v24_v17 }
  0x25   :  { %433 = vmatpush.msra.mxu3 %v23_v18 }
  0x27   :  { %434 = vmatpush.msra.mxu3 %v22_v19 }
  0x29   :  { %435 = vmatpush.msra.mxu3 %v21_v25 }
  0x2b   :  { %785 = vmatpush.msrb.mxu3 %v36_v63 }
  0x2d   :  { %786 = vmatpush.msrb.mxu3 %v35_v0 }
  0x2f   :  { %787 = vmatpush.msrb.mxu3 %v34_v1 }
  0x31   :  { %959 = vmatmul.msk.bf16.gmra.mxu0 %vm1344_vm9, %v958_v58  ;;  %788 = vmatpush.msrb.mxu3 %v33_v2 }
  0x32   :  { %371 = vmatmul.bf16.gmra.mxu1 %v193_v59 }
  0x33   :  { %965 = vmatmul.msk.bf16.gmra.mxu2 %vm1349_vm10, %v964_v61  ;;  %789 = vmatpush.msrb.mxu3 %v32_v3  ;;  %v1161_v3 = vld [vmem:[%s1552_s1 + $0x138] sm:$0xff] }
  0x34   :  { %724 = vmatpush.bf16.msrb.mxu1 %v1161_v3 }
  0x35   :  { %790 = vmatpush.msrb.mxu3 %v31_v4  ;;  %v1169_v4 = vld [vmem:[%s1552_s1 + $0x178] sm:$0xff] }
  0x36   :  { %743 = vmatpush.bf16.msrb.mxu2 %v1169_v4 }
  0x37   :  { %791 = vmatpush.msrb.mxu3 %v30_v5  ;;  %v1153_v5 = vld [vmem:[%s1552_s1 + $0xf8] sm:$0xff] }
  0x38   :  { %705 = vmatpush.bf16.msrb.mxu0 %v1153_v5 }
  0x39   :  { %792 = vmatpush.msrb.mxu3 %v29_v8  ;;  %v1152_v8 = vld [vmem:[%s1552_s1 + $0xf0] sm:$0xff] }
  0x3b   :  { %793 = vmatpush.msrb.mxu3 %v28_v9  ;;  %v1159_v9 = vld [vmem:[%s1552_s1 + $0x128] sm:$0xff] }
  0x3c   :  { %706 = vmatpush.bf16.msrb.mxu0 %v1152_v8 }
  0x3d   :  { %794 = vmatpush.msrb.mxu3 %v27_v10  ;;  %v1167_v10 = vld [vmem:[%s1552_s1 + $0x168] sm:$0xff] }
  0x3f   :  { %795 = vmatpush.msrb.mxu3 %v26_v11  ;;  %v1151_v11 = vld [vmem:[%s1552_s1 + $0xe8] sm:$0xff] }
  0x40   :  { %707 = vmatpush.bf16.msrb.mxu0 %v1151_v11 }
  0x41   :  { %796 = vmatpush.msrb.mxu3 %v25_v13  ;;  %v1166_v13 = vld [vmem:[%s1552_s1 + $0x160] sm:$0xff] }
  0x43   :  { %797 = vmatpush.msrb.mxu3 %v24_v17  ;;  %v1165_v17 = vld [vmem:[%s1552_s1 + $0x158] sm:$0xff] }
  0x45   :  { %798 = vmatpush.msrb.mxu3 %v23_v18  ;;  %v1149_v18 = vld [vmem:[%s1552_s1 + $0xd8] sm:$0xff] }
  0x47   :  { %799 = vmatpush.msrb.mxu3 %v22_v19 }
  0x49   :  { %800 = vmatpush.msrb.mxu3 %v21_v25 }
  0x9e   :  { %v348_v6 = vpop.f32.mrf.mxu0 }
  0x9f   :  { %v367_v7 = vpop.f32.mrf.mxu1 }
  0xa0   :  { %v368_v28 = vadd.f32 %v367_v7, %v348_v6  ;;  %v1160_v6 = vld [vmem:[%s1552_s1 + $0x130] sm:$0xff] }
  0xa1   :  { %725 = vmatpush.bf16.msrb.mxu1 %v1160_v6  ;;  %v1168_v7 = vld [vmem:[%s1552_s1 + $0x170] sm:$0xff] }
  0xa2   :  { %744 = vmatpush.bf16.msrb.mxu2 %v1168_v7 }
  0xa5   :  { %726 = vmatpush.bf16.msrb.mxu1 %v1159_v9 }
  0xa6   :  { %v386_v12 = vpop.f32.mrf.mxu2  ;;  %v350_v14 = vpop.f32.mrf.mxu0  ;;  %745 = vmatpush.bf16.msrb.mxu2 %v1167_v10 }
  0xa7   :  { %v369_v15 = vpop.f32.mrf.mxu1  ;;  %v1407_v33 = vadd.f32 %v386_v12, %v368_v28  ;;  %v1158_v12 = vld [vmem:[%s1552_s1 + $0x120] sm:$0xff]  ;;  %v1148_v28 = vld [vmem:[%s1552_s1 + $0xd0] sm:$0xff] }
  0xa8   :  { %v370_v29 = vadd.f32 %v369_v15, %v350_v14  ;;  %v1150_v14 = vld [vmem:[%s1552_s1 + $0xe0] sm:$0xff]  ;;  %v1157_v15 = vld [vmem:[%s1552_s1 + $0x118] sm:$0xff] }
  0xa9   :  { %v405_v38 = vmul.f32 %v1407_v33, %v1407_v33  ;;  %727 = vmatpush.bf16.msrb.mxu1 %v1158_v12  ;;  %708 = vmatpush.bf16.msrb.mxu0 %v1150_v14 }
  0xaa   :  { %746 = vmatpush.bf16.msrb.mxu2 %v1166_v13 }
  0xad   :  { %728 = vmatpush.bf16.msrb.mxu1 %v1157_v15  ;;  %709 = vmatpush.bf16.msrb.mxu0 %v1149_v18 }
  0xae   :  { %v388_v24 = vpop.f32.mrf.mxu2  ;;  %v353_v26 = vpop.f32.mrf.mxu0  ;;  %747 = vmatpush.bf16.msrb.mxu2 %v1165_v17 }
  0xaf   :  { %v372_v27 = vpop.f32.mrf.mxu1  ;;  %v1405_v32 = vadd.f32 %v388_v24, %v370_v29  ;;  %v1156_v24 = vld [vmem:[%s1552_s1 + $0x110] sm:$0xff]  ;;  %v1155_v29 = vld [vmem:[%s1552_s1 + $0x108] sm:$0xff] }
  0xb0   :  { %v373_v30 = vadd.f32 %v372_v27, %v353_v26  ;;  %v1164_v27 = vld [vmem:[%s1552_s1 + $0x150] sm:$0xff] }
  0xb1   :  { %v406_v37 = vmul.f32 %v1405_v32, %v1405_v32  ;;  %v396_v39 = vadd.f32 %v1405_v32, %v1407_v33  ;;  %729 = vmatpush.bf16.msrb.mxu1 %v1156_v24  ;;  %710 = vmatpush.bf16.msrb.mxu0 %v1148_v28 }
  0xb2   :  { %748 = vmatpush.bf16.msrb.mxu2 %v1164_v27 }
  0xb3   :  { %v409_v43 = vadd.f32 %v406_v37, %v405_v38  ;;  %v1154_v37 = vld [vmem:[%s1552_s1 + $0x100] sm:$0xff] }
  0xb4   :  { %v1162_v38 = vld [vmem:[%s1552_s1 + $0x140] sm:$0xff] }
  0xb5   :  { %730 = vmatpush.bf16.msrb.mxu1 %v1155_v29 }
  0xb6   :  { %v391_v31 = vpop.f32.mrf.mxu2  ;;  %v355_v35 = vpop.f32.mrf.mxu0 }
  0xb7   :  { %v1409_v34 = vadd.f32 %v391_v31, %v373_v30  ;;  %v374_v36 = vpop.f32.mrf.mxu1 }
  0xb8   :  { %v375_v41 = vadd.f32 %v374_v36, %v355_v35  ;;  %v1163_v35 = vld [vmem:[%s1552_s1 + $0x148] sm:$0xff] }
  0xb9   :  { %v407_v40 = vmul.f32 %v1409_v34, %v1409_v34  ;;  %v397_v44 = vadd.f32 %v396_v39, %v1409_v34  ;;  %v1147_v36 = vld [vmem:[%s1552_s1 + $0xc8] sm:$0xff]  ;;  %749 = vmatpush.bf16.msrb.mxu2 %v1163_v35  ;;  %v1146_v39 = vld [vmem:[%s1552_s1 + $0xc0] sm:$0xff]  ;;  %731 = vmatpush.bf16.msrb.mxu1 %v1154_v37 }
  0xba   :  { %711 = vmatpush.bf16.msrb.mxu0 %v1147_v36 }
  0xbb   :  { %v410_v48 = vadd.f32 %v409_v43, %v407_v40  ;;  %v1501_v43 = vld [vmem:[%s1555_s3] sm:$0xf] }
  0xbd   :  { %750 = vmatpush.bf16.msrb.mxu2 %v1162_v38 }
  0xbe   :  { %v393_v42 = vpop.f32.mrf.mxu2  ;;  %712 = vmatpush.bf16.msrb.mxu0 %v1146_v39 }
  0xbf   :  { %v1420_v46 = vadd.f32 %v393_v42, %v375_v41 }
  0xc1   :  { %v398_v49 = vadd.f32 %v397_v44, %v1420_v46  ;;  %v408_v50 = vmul.f32 %v1420_v46, %v1420_v46 }
  0xc3   :  { %v399_v51 = vrot.slane %v398_v49, 4  ;;  %v411_v52 = vadd.f32 %v410_v48, %v408_v50 }
  0xc5   :  { %v400_v53 = vadd.f32 %v399_v51, %v398_v49  ;;  %v412_v54 = vrot.slane %v411_v52, 4  ;;  %v457_v49 = vrot.slane %v1501_v43, 7 }
  0xc7   :  { %v401_v55 = vrot.slane %v400_v53, 2  ;;  %v413_v56 = vadd.f32 %v412_v54, %v411_v52 }
  0xc9   :  { %v402_v57 = vadd.f32 %v401_v55, %v400_v53  ;;  %v414_v58 = vrot.slane %v413_v56, 2 }
  0xcb   :  { %v403_v59 = vrot.slane %v402_v57, 1  ;;  %v415_v61 = vadd.f32 %v414_v58, %v413_v56 }
  0xcd   :  { %v416_v63 = vrot.slane %v415_v61, 1  ;;  %v404_v0 = vadd.f32 %v403_v59, %v402_v57 }
  0xcf   :  { %v417_v1 = vadd.f32 %v416_v63, %v415_v61 }
  0xd1   :  { %v419_v2 = vsel %vm418_vm11, %v404_v0, %v417_v1 }
  0xd2   :  { %436 = vmatmul.f32.vlgmr.msra.gmra.mxu3 %v419_v2 }
 0x155   :  { %v437_v19 = vpop.f32.mrf.mxu3 }
 0x156   :  { %v440_v25 = vmul.f32 %v437_v19, %v437_v19 }
 0x158   :  { %v442_v26 = vrot.slane %v440_v25, 7 }
 0x15a   :  { %v444_v30 = vsub.f32 %v437_v19, %v442_v26 }
 0x15c   :  { %v445_v31 = vadd.f32 1e-05, %v444_v30 }
 0x15e   :  { %1171 = vrsqrt.f32 %v445_v31  ;;  %vm452_vm13 = vweird.f32 %v445_v31 }
 0x164   :  { %v1172_v40 = vpop.eup %1171 }
 0x165   :  { %v447_v41 = vmul.f32 %v1172_v40, %v445_v31  ;;  %vm453_vm12 = vweird.f32 %v1172_v40 }
 0x166   :  { %vm454_vm14 = vmor %vm452_vm13, %vm453_vm12 }
 0x167   :  { %v448_v42 = vmul.f32 %v1172_v40, %v447_v41 }
 0x169   :  { %v449_v44 = vmul.f32 0.5, %v448_v42 }
 0x16b   :  { %v450_v48 = vsub.f32 1.5, %v449_v44 }
 0x16d   :  { %v451_v50 = vmul.f32 %v1172_v40, %v450_v48 }
 0x16f   :  { %v455_v51 = vsel %vm454_vm14, %v1172_v40, %v451_v50 }
 0x170   :  { %v459_v52 = vmul.f32 %v457_v49, %v455_v51 }
 0x172   :  { %v466_v53 = vrot.slane %v459_v52, 1  ;;  %v460_v55 = vperm.slane %v459_v52, 1 }
 0x174   :  { %v468_v54 = vmul.f32 %v466_v53, %v437_v19  ;;  %v463_v58 = vmul.f32 %v460_v55, %v1409_v34  ;;  %v464_v59 = vmul.f32 %v460_v55, %v1420_v46  ;;  %v461_v63 = vmul.f32 %v460_v55, %v1407_v33 }
 0x175   :  { %v462_v0 = vmul.f32 %v460_v55, %v1405_v32 }
 0x176   :  { %v470_v56 = vrot.slane %v468_v54, 7 }
 0x178   :  { %v472_v57 = vsub.f32 %v1501_v43, %v470_v56 }
 0x17a   :  { %v473_v61 = vperm.slane %v472_v57, 1 }
 0x17c   :  { %v476_v1 = vadd.f32 %v473_v61, %v463_v58  ;;  %v477_v2 = vadd.f32 %v473_v61, %v464_v59  ;;  %v474_v3 = vadd.f32 %v473_v61, %v461_v63  ;;  %v475_v4 = vadd.f32 %v473_v61, %v462_v0 }
 0x17e   :  { %v480_v5 = vmax.f32 %v476_v1, 0.0  ;;  %v481_v6 = vmax.f32 %v477_v2, 0.0  ;;  %v478_v7 = vmax.f32 %v474_v3, 0.0  ;;  %v479_v8 = vmax.f32 %v475_v4, 0.0 }
 0x180   :  { %v556_v9 = vpack.c.bf16 %v479_v8, %v478_v7  ;;  %v531_v10 = vrot.slane %v478_v7, 7  ;;  %v532_v11 = vrot.slane %v479_v8, 7  ;;  %v534_v12 = vrot.slane %v481_v6, 7 }
 0x181   :  { %v543_v34 = vrot.slane %v478_v7, 1  ;;  %v544_v13 = vrot.slane %v479_v8, 1  ;;  %v545_v46 = vrot.slane %v480_v5, 1  ;;  %v533_v19 = vrot.slane %v480_v5, 7 }
 0x182   :  { %732 = vmatmul.bf16.vlgmr.msrb.gmra.mxu1 %v556_v9  ;;  %v537_v33 = vsel %vm151_vm0, %v531_v10, %v532_v11  ;;  %v538_v32 = vsel %vm151_vm0, %v534_v12, %v531_v10  ;;  %v546_v24 = vrot.slane %v481_v6, 1  ;;  %v559_v25 = vpack.c.bf16 %v481_v6, %v480_v5 }
 0x183   :  { %v1111_v14 = vpack.c.bf16 %v537_v33, %v538_v32  ;;  %v548_v15 = vsel %vm172_vm1, %v544_v13, %v545_v46  ;;  %v549_v17 = vsel %vm172_vm1, %v543_v34, %v544_v13  ;;  %v535_v26 = vsel %vm151_vm0, %v533_v19, %v534_v12 }
 0x184   :  { %v1117_v18 = vpack.c.bf16 %v548_v15, %v549_v17  ;;  %v536_v27 = vsel %vm151_vm0, %v532_v11, %v533_v19  ;;  %v547_v28 = vsel %vm172_vm1, %v545_v46, %v546_v24  ;;  %v550_v29 = vsel %vm172_vm1, %v546_v24, %v543_v34 }
 0x185   :  { %1112 = vmatmul.msk.bf16.vlgmr.msrb.gmra.mxu0 %vm1316_vm5, %v1111_v14  ;;  %v1114_v45 = vpack.c.bf16 %v535_v26, %v536_v27  ;;  %v1120_v30 = vpack.c.bf16 %v550_v29, %v547_v28  ;;  %v821_v26 = vrot.slane %v1501_v43, 1 }
 0x186   :  { %1118 = vmatmul.msk.bf16.vlgmr.msrb.gmra.mxu2 %vm1321_vm6, %v1117_v18 }
 0x192   :  { %737 = vmatmul.bf16.gmra.mxu1 %v559_v25 }
 0x195   :  { %1115 = vmatmul.msk.bf16.gmra.mxu0 %vm1344_vm9, %v1114_v45 }
 0x196   :  { %1121 = vmatmul.msk.bf16.gmra.mxu2 %vm1349_vm10, %v1120_v30 }
 0x1ff   :  { %v733_v47 = vpop.f32.mrf.mxu1 }
 0x202   :  { %v714_v31 = vpop.f32.mrf.mxu0 }
 0x203   :  { %v734_v42 = vadd.f32 %v733_v47, %v714_v31 }
 0x207   :  { %v735_v37 = vpop.f32.mrf.mxu1 }
 0x209   :  { %v752_v35 = vpop.f32.mrf.mxu2 }
 0x20a   :  { %v716_v36 = vpop.f32.mrf.mxu0  ;;  %v753_v49 = vadd.f32 %v752_v35, %v734_v42 }
 0x20b   :  { %v736_v41 = vadd.f32 %v735_v37, %v716_v36 }
 0x20c   :  { %v771_v62 = vmul.f32 %v753_v49, %v753_v49 }
 0x20f   :  { %v738_v40 = vpop.f32.mrf.mxu1 }
 0x211   :  { %v754_v38 = vpop.f32.mrf.mxu2 }
 0x212   :  { %v719_v39 = vpop.f32.mrf.mxu0  ;;  %v755_v44 = vadd.f32 %v754_v38, %v736_v41 }
 0x213   :  { %v739_v48 = vadd.f32 %v738_v40, %v719_v39 }
 0x214   :  { %v772_v51 = vmul.f32 %v755_v44, %v755_v44  ;;  %v762_v53 = vadd.f32 %v755_v44, %v753_v49 }
 0x216   :  { %v775_v57 = vadd.f32 %v772_v51, %v771_v62 }
 0x217   :  { %v740_v52 = vpop.f32.mrf.mxu1 }
 0x219   :  { %v757_v16 = vpop.f32.mrf.mxu2 }
 0x21a   :  { %v758_v50 = vadd.f32 %v757_v16, %v739_v48  ;;  %v721_v60 = vpop.f32.mrf.mxu0 }
 0x21b   :  { %v741_v55 = vadd.f32 %v740_v52, %v721_v60 }
 0x21c   :  { %v773_v54 = vmul.f32 %v758_v50, %v758_v50  ;;  %v763_v58 = vadd.f32 %v762_v53, %v758_v50 }
 0x21e   :  { %v776_v61 = vadd.f32 %v775_v57, %v773_v54 }
 0x221   :  { %v759_v56 = vpop.f32.mrf.mxu2 }
 0x222   :  { %v760_v59 = vadd.f32 %v759_v56, %v741_v55 }
 0x224   :  { %v764_v63 = vadd.f32 %v763_v58, %v760_v59  ;;  %v774_v0 = vmul.f32 %v760_v59, %v760_v59 }
 0x226   :  { %v765_v1 = vrot.slane %v764_v63, 4  ;;  %v777_v2 = vadd.f32 %v776_v61, %v774_v0 }
 0x228   :  { %v766_v3 = vadd.f32 %v765_v1, %v764_v63  ;;  %v778_v4 = vrot.slane %v777_v2, 4 }
 0x22a   :  { %v767_v5 = vrot.slane %v766_v3, 2  ;;  %v779_v6 = vadd.f32 %v778_v4, %v777_v2 }
 0x22c   :  { %v768_v7 = vadd.f32 %v767_v5, %v766_v3  ;;  %v780_v8 = vrot.slane %v779_v6, 2 }
 0x22e   :  { %v769_v9 = vrot.slane %v768_v7, 1  ;;  %v781_v10 = vadd.f32 %v780_v8, %v779_v6 }
 0x230   :  { %v782_v11 = vrot.slane %v781_v10, 1  ;;  %v770_v12 = vadd.f32 %v769_v9, %v768_v7 }
 0x232   :  { %v783_v34 = vadd.f32 %v782_v11, %v781_v10 }
 0x234   :  { %v784_v13 = vsel %vm418_vm11, %v770_v12, %v783_v34 }
 0x235   :  { %801 = vmatmul.f32.vlgmr.msrb.gmra.mxu3 %v784_v13 }
 0x2b8   :  { %v802_v46 = vpop.f32.mrf.mxu3 }
 0x2b9   :  { %v805_v33 = vmul.f32 %v802_v46, %v802_v46 }
 0x2bb   :  { %v807_v32 = vrot.slane %v805_v33, 7 }
 0x2bd   :  { %v809_v14 = vsub.f32 %v802_v46, %v807_v32 }
 0x2bf   :  { %v810_v15 = vadd.f32 1e-05, %v809_v14 }
 0x2c1   :  { %1173 = vrsqrt.f32 %v810_v15  ;;  %vm817_vm0 = vweird.f32 %v810_v15 }
 0x2c7   :  { %v1174_v17 = vpop.eup %1173 }
 0x2c8   :  { %v812_v18 = vmul.f32 %v1174_v17, %v810_v15  ;;  %vm818_vm15 = vweird.f32 %v1174_v17 }
 0x2c9   :  { %vm819_vm1 = vmor %vm817_vm0, %vm818_vm15 }
 0x2ca   :  { %v813_v19 = vmul.f32 %v1174_v17, %v812_v18 }
 0x2cc   :  { %v814_v24 = vmul.f32 0.5, %v813_v19 }
 0x2ce   :  { %v815_v25 = vsub.f32 1.5, %v814_v24 }
 0x2d0   :  { %v816_v27 = vmul.f32 %v1174_v17, %v815_v25 }
 0x2d2   :  { %v820_v28 = vsel %vm819_vm1, %v1174_v17, %v816_v27 }
 0x2d3   :  { %v823_v29 = vmul.f32 %v821_v26, %v820_v28 }
 0x2d5   :  { %v830_v45 = vrot.slane %v823_v29, 1  ;;  %v824_v47 = vperm.slane %v823_v29, 1 }
 0x2d7   :  { %v832_v30 = vmul.f32 %v830_v45, %v802_v46  ;;  %v825_v36 = vmul.f32 %v824_v47, %v753_v49  ;;  %v826_v37 = vmul.f32 %v824_v47, %v755_v44  ;;  %v827_v38 = vmul.f32 %v824_v47, %v758_v50 }
 0x2d8   :  { %v828_v39 = vmul.f32 %v824_v47, %v760_v59 }
 0x2d9   :  { %v834_v31 = vrot.slane %v832_v30, 5 }
 0x2db   :  { %v836_v35 = vsub.f32 %v1501_v43, %v834_v31 }
 0x2dd   :  { %v837_v40 = vperm.slane %v836_v35, 3 }
 0x2df   :  { %v838_v41 = vadd.f32 %v837_v40, %v825_v36  ;;  %v839_v16 = vadd.f32 %v837_v40, %v826_v37  ;;  %v840_v42 = vadd.f32 %v837_v40, %v827_v38  ;;  %v841_v48 = vadd.f32 %v837_v40, %v828_v39 }
 0x2e1   :  { %v842_v60 = vadd.f32 %v838_v41, %v1260_v20  ;;  %v843_v51 = vadd.f32 %v839_v16, %v1265_v21  ;;  %v844_v52 = vadd.f32 %v840_v42, %v1275_v23  ;;  %v845_v62 = vadd.f32 %v841_v48, %v1270_v22 }
 0x2e3   :  { %v846_v53 = vmax.f32 %v842_v60, 0.0  ;;  %v847_v54 = vmax.f32 %v843_v51, 0.0  ;;  %v848_v43 = vmax.f32 %v844_v52, 0.0  ;;  %v849_v49 = vmax.f32 %v845_v62, 0.0 }
 0x2e5   :  { %850 = vst [vmem:[%s1556_s4] sm:$0xff] %v846_v53 }
 0x2e6   :  { %851 = vst [vmem:[%s1556_s4 + $0x8] sm:$0xff] %v847_v54 }
 0x2e7   :  { %852 = vst [vmem:[%s1556_s4 + $0x10] sm:$0xff] %v848_v43 }
 0x2e8   :  { %853 = vst [vmem:[%s1556_s4 + $0x18] sm:$0xff] %v849_v49 }

</bundles_post_ra>
